<compile_context>
chip_gen: v6e
topology: v6e:2x2x1
jax: 0.10.0
libtpu: 0.0.40
codegen_flags: <defaults>
</compile_context>

<pallas_src>
import functools

import jax
import jax.numpy as jnp
from jax.experimental import pallas as pl
from jax.experimental.pallas import tpu as pltpu


# ----------------------------- Pallas kernel -------------------------------


def radio_encoder_kernel(
    patches_ref,   # (TM, Kp)     bf16  patchified image tokens (K zero-padded)
    we_ref,        # (Kp, HID)    bf16  patch-embed weight (in x out), VMEM-resident
    w1_ref,        # (HID, PROJ)  bf16  alignment linear_layer1 weight (in x out)
    w2_ref,        # (PROJ, PROJ) bf16  alignment linear_layer2 weight (in x out)
    be_ref,        # (1, HID)     f32   patch-embed bias
    b1_ref,        # (1, PROJ)    f32
    b2_ref,        # (1, PROJ)    f32
    gamma_ref,     # (1, PROJ)    f32   LayerNorm weight
    beta_ref,      # (1, PROJ)    f32   LayerNorm bias
    o_ref,         # (TM, PROJ)   out dtype
    *,
    approximate_gelu: bool,
):
    x = patches_ref[...]                                              # bf16

    # --- synthetic "pretrained encoder": patch embedding -> last_hidden_state
    # bf16 x bf16 on the MXU, f32 accumulation; bias add fused with the bf16 cast
    # so only one (TM, HID) activation copy stays live.
    h = (jnp.dot(x, we_ref[...], preferred_element_type=jnp.float32)
         + be_ref[...]).astype(jnp.bfloat16)

    # --- AlignmentLayer ---
    # linear_layer1
    z = jnp.dot(h, w1_ref[...], preferred_element_type=jnp.float32) + b1_ref[...]
    # GELU: tanh approximation by default (EUP slot, free under MXU-bound loop);
    # set approximate_gelu=False for bit-parity with nn.GELU()'s exact erf.
    z = jax.nn.gelu(z, approximate=approximate_gelu)
    # linear_layer2
    z = jnp.dot(z.astype(jnp.bfloat16), w2_ref[...],
                preferred_element_type=jnp.float32) + b2_ref[...]
    # dropout: eval-mode identity (PyTorch nn.Dropout is a no-op in eval)

    # LayerNorm over last dim (eps = 1e-5, PyTorch default), kept in f32.
    mean = jnp.mean(z, axis=-1, keepdims=True)
    centered = z - mean
    var = jnp.mean(centered * centered, axis=-1, keepdims=True)
    normed = centered * jax.lax.rsqrt(var + 1e-5)
    o_ref[...] = (normed * gamma_ref[...] + beta_ref[...]).astype(o_ref.dtype)


# ------------------------------ wrapper -------------------------------------


def _round_up(x, m):
    return (x + m - 1) // m * m


def _default_vmem_limit_bytes():
    """Per-generation scoped-VMEM cap: headroom on v7x, big tiles on v5e/v6e."""
    try:
        kind = jax.devices()[0].device_kind.lower()
    except Exception:  # pragma: no cover - defensive
        kind = ""
    if "v5" in kind or "v6" in kind:
        return 96 * 1024 * 1024       # 128 MiB physical parts
    if "7" in kind:
        return 48 * 1024 * 1024       # v7x: 64 MiB physical, leave headroom
    return 64 * 1024 * 1024


def radio_encoder_forward(
    image,
    params,
    *,
    patch=8,
    row_tile=512,                  # 512 saturates the MXU on v5e/v6e; auto-clamped
    out_dtype=jnp.bfloat16,        # serving dtype; halves output HBM writeback
    approximate_gelu=True,         # tanh GELU (EUP); False for exact-erf parity
    vmem_limit_bytes=None,         # None -> per-chip default
):
    """image: (B, C, H, W) float32 NCHW.  Returns (B, S, projection_dim)."""
    B, C, H, W = image.shape
    P = patch
    assert H % P == 0 and W % P == 0
    S = (H // P) * (W // P)
    K = C * P * P
    K_pad = _round_up(K, 128)      # MXU-aligned contraction dim

    HID = params["we"].shape[1]
    PROJ = params["w1"].shape[1]
    # Lane-dense feature dims: avoids masked partial stores and wasted MXU columns.
    # For production on v6e/v7x prefer multiples of 256 (full MXU width); RADIO's
    # hidden=1280 / projection=1024 already satisfy this.
    assert HID % 128 == 0 and PROJ % 128 == 0, (
        "hidden / projection dims must be multiples of 128 (pad the weights)")

    # glue: patchify NCHW -> (B*S, K), done in bf16 to halve the transpose's HBM
    # traffic, then zero-pad K to the MXU width.
    # TODO(synk): the patchify gather could be folded into the kernel via a
    # (B*H/P)-grid image BlockSpec to drop one HBM round trip; not needed here.
    img = image.astype(jnp.bfloat16)
    patches = img.reshape(B, C, H // P, P, W // P, P)
    patches = patches.transpose(0, 2, 4, 1, 3, 5)            # (B, H/P, W/P, C, P, P)
    patches = patches.reshape(B * S, K)
    if K_pad != K:
        patches = jnp.pad(patches, ((0, 0), (0, K_pad - K)))

    M = B * S
    M16 = _round_up(M, 16)                      # bf16 sublane packing granule
    tile = max(16, min(_round_up(row_tile, 16), M16))
    # v7x has 2 TensorCores: make sure the "parallel" token axis has >= 2 grid
    # steps whenever there are enough rows to split (costs ~0.35 µs on 1-TC chips).
    if M16 >= 32 and tile >= M16:
        tile = _round_up(pl.cdiv(M16, 2), 16)
    M_pad = _round_up(M, tile)
    if M_pad != M:
        patches = jnp.pad(patches, ((0, M_pad - M), (0, 0)))

    grid = (M_pad // tile,)

    # bf16 weights for the MXU; f32 biases / LayerNorm affine for the epilogue.
    we = params["we"].astype(jnp.bfloat16)
    if K_pad != K:
        we = jnp.pad(we, ((0, K_pad - K), (0, 0)))
    w1 = params["w1"].astype(jnp.bfloat16)
    w2 = params["w2"].astype(jnp.bfloat16)
    be = params["be"].astype(jnp.float32)
    b1 = params["b1"].astype(jnp.float32)
    b2 = params["b2"].astype(jnp.float32)
    gamma = params["gamma"].astype(jnp.float32)
    beta = params["beta"].astype(jnp.float32)

    def row_map(i):
        return (i, 0)

    # Constant-index operands: whole-array, VMEM-resident, single-buffered by
    # construction (no pipeline double buffer — pure VMEM savings).
    const_spec = pl.BlockSpec(memory_space=pltpu.MemorySpace.VMEM)

    kernel = functools.partial(radio_encoder_kernel,
                               approximate_gelu=approximate_gelu)

    if vmem_limit_bytes is None:
        vmem_limit_bytes = _default_vmem_limit_bytes()

    out = pl.pallas_call(
        kernel,
        out_shape=jax.ShapeDtypeStruct((M_pad, PROJ), out_dtype),
        grid_spec=pltpu.PrefetchScalarGridSpec(
            num_scalar_prefetch=0,
            grid=grid,
            in_specs=[
                pl.BlockSpec((tile, K_pad), row_map),   # patches (row-tiled, pipelined)
                const_spec,                             # we
                const_spec,                             # w1
                const_spec,                             # w2
                const_spec,                             # be
                const_spec,                             # b1
                const_spec,                             # b2
                const_spec,                             # gamma
                const_spec,                             # beta
            ],
            out_specs=pl.BlockSpec((tile, PROJ), row_map),
        ),
        compiler_params=pltpu.CompilerParams(
            dimension_semantics=("parallel",),
            vmem_limit_bytes=vmem_limit_bytes,
        ),
    )(patches, we, w1, w2, be, b1, b2, gamma, beta)

    return out[:M].reshape(B, S, PROJ)


# ---------------------- deterministic parameter init ------------------------


def init_params(key, *, patch_dim, hidden, proj):
    ks = jax.random.split(key, 6)
    scale_e = 1.0 / jnp.sqrt(patch_dim)
    scale_1 = 1.0 / jnp.sqrt(hidden)
    scale_2 = 1.0 / jnp.sqrt(proj)
    # weights stored as (in, out), i.e. PyTorch nn.Linear weight transposed
    return {
        "we": jax.random.normal(ks[0], (patch_dim, hidden), jnp.float32) * scale_e,
        "be": jax.random.normal(ks[1], (1, hidden), jnp.float32) * 0.01,
        "w1": jax.random.normal(ks[2], (hidden, proj), jnp.float32) * scale_1,
        "b1": jax.random.normal(ks[3], (1, proj), jnp.float32) * 0.01,
        "w2": jax.random.normal(ks[4], (proj, proj), jnp.float32) * scale_2,
        "b2": jax.random.normal(ks[5], (1, proj), jnp.float32) * 0.01,
        "gamma": jnp.ones((1, proj), jnp.float32),
        "beta": jnp.zeros((1, proj), jnp.float32),
    }


# ------------------------ pure-JAX reference (check) -------------------------


def reference_forward(image, params, *, patch=8, out_dtype=jnp.bfloat16,
                      approximate_gelu=True):
    """Numerically matched reference: same bf16-operand / f32-accumulation recipe.

    Note: bf16 MXU feeds + (optional) tanh GELU deviate slightly from the f32
    erf-GELU numerics of the original torch module; the check is self-consistent.
    """
    B, C, H, W = image.shape
    P = patch
    S = (H // P) * (W // P)
    patches = image.astype(jnp.bfloat16).reshape(B, C, H // P, P, W // P, P)
    patches = patches.transpose(0, 2, 4, 1, 3, 5).reshape(B * S, C * P * P)
    we = params["we"].astype(jnp.bfloat16)
    w1 = params["w1"].astype(jnp.bfloat16)
    w2 = params["w2"].astype(jnp.bfloat16)
    h = (jnp.dot(patches, we, preferred_element_type=jnp.float32)
         + params["be"]).astype(jnp.bfloat16)
    z = jnp.dot(h, w1, preferred_element_type=jnp.float32) + params["b1"]
    z = jax.nn.gelu(z, approximate=approximate_gelu)
    z = jnp.dot(z.astype(jnp.bfloat16), w2,
                preferred_element_type=jnp.float32) + params["b2"]
    mean = jnp.mean(z, axis=-1, keepdims=True)
    var = jnp.mean((z - mean) ** 2, axis=-1, keepdims=True)
    z = (z - mean) * jax.lax.rsqrt(var + 1e-5)
    z = z * params["gamma"] + params["beta"]
    return z.astype(out_dtype).reshape(B, S, -1)


# ----------------------------------- main ------------------------------------

if __name__ == "__main__":
    # Small demo shapes consistent with the module's forward:
    #   image (B, C, H, W) -> last_hidden_state (B, S, hidden) -> projection (B, S, proj)
    # hidden / proj are the smallest lane-dense (multiple-of-128) sizes; the real
    # RADIO backbone uses hidden~1280, projection_dim~1024 (multiples of 256).
    B, C, H, W = 2, 4, 16, 16
    PATCH = 8
    HIDDEN = 256         # stands in for pretrained_encoder.config.hidden_size
    PROJ = 128           # stands in for CFG.projection_dim

    key = jax.random.PRNGKey(0)
    k_img, k_par = jax.random.split(key)
    image = jax.random.normal(k_img, (B, C, H, W), jnp.float32)
    params = init_params(k_par, patch_dim=C * PATCH * PATCH, hidden=HIDDEN, proj=PROJ)

    fwd = jax.jit(functools.partial(radio_encoder_forward, patch=PATCH))
    out = jax.block_until_ready(fwd(image, params))

    ref = reference_forward(image, params, patch=PATCH)
    assert out.shape == (B, (H // PATCH) * (W // PATCH), PROJ)
    assert jnp.allclose(out.astype(jnp.float32), ref.astype(jnp.float32),
                        atol=1e-2, rtol=1e-2)

    # TODO(synk): the real HF pretrained RADIO backbone (AutoModel.from_pretrained)
    # is replaced by a deterministic synthetic patch-embedding encoder; no
    # checkpoint loading is performed.
    print("KERNEL_OK")
</pallas_src>

<mosaic_0001>
module attributes {stable_mosaic.version = 11 : i64} {
  func.func @radio_encoder_kernel(%arg0: i32, %arg1: memref<16x256xbf16, #tpu.memory_space<vmem>>, %arg2: memref<256x256xbf16, #tpu.memory_space<vmem>>, %arg3: memref<256x128xbf16, #tpu.memory_space<vmem>>, %arg4: memref<128x128xbf16, #tpu.memory_space<vmem>>, %arg5: memref<1x256xf32, #tpu.memory_space<vmem>>, %arg6: memref<1x128xf32, #tpu.memory_space<vmem>>, %arg7: memref<1x128xf32, #tpu.memory_space<vmem>>, %arg8: memref<1x128xf32, #tpu.memory_space<vmem>>, %arg9: memref<1x128xf32, #tpu.memory_space<vmem>>, %arg10: memref<16x128xbf16, #tpu.memory_space<vmem>>) attributes {dimension_semantics = [#tpu.dimension_semantics<parallel>], iteration_bounds = array<i64: 1>, scalar_prefetch = 0 : i64, scratch_operands = 0 : i64, tpu.core_type = #tpu.core_type<tc>, window_params = [{transform_indices = @transform_0, window_bounds = array<i64: 16, 256>}, {pipeline_mode = #tpu.pipeline_mode<synchronous>, transform_indices = @transform_1, window_bounds = array<i64: 256, 256>}, {pipeline_mode = #tpu.pipeline_mode<synchronous>, transform_indices = @transform_2, window_bounds = array<i64: 256, 128>}, {pipeline_mode = #tpu.pipeline_mode<synchronous>, transform_indices = @transform_3, window_bounds = array<i64: 128, 128>}, {pipeline_mode = #tpu.pipeline_mode<synchronous>, transform_indices = @transform_4, window_bounds = array<i64: 1, 256>}, {pipeline_mode = #tpu.pipeline_mode<synchronous>, transform_indices = @transform_5, window_bounds = array<i64: 1, 128>}, {pipeline_mode = #tpu.pipeline_mode<synchronous>, transform_indices = @transform_6, window_bounds = array<i64: 1, 128>}, {pipeline_mode = #tpu.pipeline_mode<synchronous>, transform_indices = @transform_7, window_bounds = array<i64: 1, 128>}, {pipeline_mode = #tpu.pipeline_mode<synchronous>, transform_indices = @transform_8, window_bounds = array<i64: 1, 128>}, {transform_indices = @transform_9, window_bounds = array<i64: 16, 128>}]} {
    %c0 = arith.constant 0 : index
    %c0_0 = arith.constant 0 : index
    %0 = vector.load %arg1[%c0, %c0_0] : memref<16x256xbf16, #tpu.memory_space<vmem>>, vector<16x256xbf16>
    %c0_1 = arith.constant 0 : index
    %c0_2 = arith.constant 0 : index
    %1 = vector.load %arg2[%c0_1, %c0_2] : memref<256x256xbf16, #tpu.memory_space<vmem>>, vector<256x256xbf16>
    %cst = arith.constant dense<0.000000e+00> : vector<16x256xf32>
    %2 = tpu.matmul %0, %1, %cst {dimension_numbers = #tpu.dot_dimension_numbers<[1], [0], [0], [1], [0, 0, 1, 1], [], []>} : vector<16x256xbf16>, vector<256x256xbf16>, vector<16x256xf32> -> vector<16x256xf32>
    %c0_3 = arith.constant 0 : index
    %c0_4 = arith.constant 0 : index
    %3 = vector.load %arg5[%c0_3, %c0_4] : memref<1x256xf32, #tpu.memory_space<vmem>>, vector<1x256xf32>
    %4 = vector.broadcast %3 : vector<1x256xf32> to vector<16x256xf32>
    %5 = arith.addf %2, %4 : vector<16x256xf32>
    %6 = arith.truncf %5 : vector<16x256xf32> to vector<16x256xbf16>
    %c0_5 = arith.constant 0 : index
    %c0_6 = arith.constant 0 : index
    %7 = vector.load %arg3[%c0_5, %c0_6] : memref<256x128xbf16, #tpu.memory_space<vmem>>, vector<256x128xbf16>
    %cst_7 = arith.constant dense<0.000000e+00> : vector<16x128xf32>
    %8 = tpu.matmul %6, %7, %cst_7 {dimension_numbers = #tpu.dot_dimension_numbers<[1], [0], [0], [1], [0, 0, 1, 1], [], []>} : vector<16x256xbf16>, vector<256x128xbf16>, vector<16x128xf32> -> vector<16x128xf32>
    %c0_8 = arith.constant 0 : index
    %c0_9 = arith.constant 0 : index
    %9 = vector.load %arg6[%c0_8, %c0_9] : memref<1x128xf32, #tpu.memory_space<vmem>>, vector<1x128xf32>
    %10 = vector.broadcast %9 : vector<1x128xf32> to vector<16x128xf32>
    %11 = arith.addf %8, %10 : vector<16x128xf32>
    %12 = arith.mulf %11, %11 : vector<16x128xf32>
    %13 = arith.mulf %11, %12 : vector<16x128xf32>
    %cst_10 = arith.constant 4.471500e-02 : f32
    %14 = vector.broadcast %cst_10 : f32 to vector<16x128xf32>
    %15 = arith.mulf %14, %13 : vector<16x128xf32>
    %16 = arith.addf %11, %15 : vector<16x128xf32>
    %cst_11 = arith.constant 0.797884583 : f32
    %17 = vector.broadcast %cst_11 : f32 to vector<16x128xf32>
    %18 = arith.mulf %17, %16 : vector<16x128xf32>
    %19 = math.tanh %18 : vector<16x128xf32>
    %cst_12 = arith.constant 1.000000e+00 : f32
    %20 = vector.broadcast %cst_12 : f32 to vector<16x128xf32>
    %21 = arith.addf %20, %19 : vector<16x128xf32>
    %cst_13 = arith.constant 5.000000e-01 : f32
    %22 = vector.broadcast %cst_13 : f32 to vector<16x128xf32>
    %23 = arith.mulf %22, %21 : vector<16x128xf32>
    %24 = arith.mulf %11, %23 : vector<16x128xf32>
    %25 = arith.truncf %24 : vector<16x128xf32> to vector<16x128xbf16>
    %c0_14 = arith.constant 0 : index
    %c0_15 = arith.constant 0 : index
    %26 = vector.load %arg4[%c0_14, %c0_15] : memref<128x128xbf16, #tpu.memory_space<vmem>>, vector<128x128xbf16>
    %cst_16 = arith.constant dense<0.000000e+00> : vector<16x128xf32>
    %27 = tpu.matmul %25, %26, %cst_16 {dimension_numbers = #tpu.dot_dimension_numbers<[1], [0], [0], [1], [0, 0, 1, 1], [], []>} : vector<16x128xbf16>, vector<128x128xbf16>, vector<16x128xf32> -> vector<16x128xf32>
    %c0_17 = arith.constant 0 : index
    %c0_18 = arith.constant 0 : index
    %28 = vector.load %arg7[%c0_17, %c0_18] : memref<1x128xf32, #tpu.memory_space<vmem>>, vector<1x128xf32>
    %29 = vector.broadcast %28 : vector<1x128xf32> to vector<16x128xf32>
    %30 = arith.addf %27, %29 : vector<16x128xf32>
    %cst_19 = arith.constant dense<0.000000e+00> : vector<16xf32>
    %31 = vector.multi_reduction <add>, %30, %cst_19 [1] : vector<16x128xf32> to vector<16xf32>
    %32 = vector.shape_cast %31 : vector<16xf32> to vector<16x1xf32>
    %cst_20 = arith.constant 1.280000e+02 : f32
    %33 = vector.broadcast %cst_20 : f32 to vector<16x1xf32>
    %34 = arith.divf %32, %33 : vector<16x1xf32>
    %35 = vector.broadcast %34 : vector<16x1xf32> to vector<16x128xf32>
    %36 = arith.subf %30, %35 : vector<16x128xf32>
    %37 = arith.mulf %36, %36 : vector<16x128xf32>
    %cst_21 = arith.constant dense<0.000000e+00> : vector<16xf32>
    %38 = vector.multi_reduction <add>, %37, %cst_21 [1] : vector<16x128xf32> to vector<16xf32>
    %39 = vector.shape_cast %38 : vector<16xf32> to vector<16x1xf32>
    %cst_22 = arith.constant 1.280000e+02 : f32
    %40 = vector.broadcast %cst_22 : f32 to vector<16x1xf32>
    %41 = arith.divf %39, %40 : vector<16x1xf32>
    %cst_23 = arith.constant 9.99999974E-6 : f32
    %42 = vector.broadcast %cst_23 : f32 to vector<16x1xf32>
    %43 = arith.addf %41, %42 : vector<16x1xf32>
    %44 = math.rsqrt %43 : vector<16x1xf32>
    %45 = vector.broadcast %44 : vector<16x1xf32> to vector<16x128xf32>
    %46 = arith.mulf %36, %45 : vector<16x128xf32>
    %c0_24 = arith.constant 0 : index
    %c0_25 = arith.constant 0 : index
    %47 = vector.load %arg8[%c0_24, %c0_25] : memref<1x128xf32, #tpu.memory_space<vmem>>, vector<1x128xf32>
    %48 = vector.broadcast %47 : vector<1x128xf32> to vector<16x128xf32>
    %49 = arith.mulf %46, %48 : vector<16x128xf32>
    %c0_26 = arith.constant 0 : index
    %c0_27 = arith.constant 0 : index
    %50 = vector.load %arg9[%c0_26, %c0_27] : memref<1x128xf32, #tpu.memory_space<vmem>>, vector<1x128xf32>
    %51 = vector.broadcast %50 : vector<1x128xf32> to vector<16x128xf32>
    %52 = arith.addf %49, %51 : vector<16x128xf32>
    %53 = arith.truncf %52 : vector<16x128xf32> to vector<16x128xbf16>
    %c0_28 = arith.constant 0 : index
    %c0_29 = arith.constant 0 : index
    %54 = vector.load %arg10[%c0_28, %c0_29] : memref<16x128xbf16, #tpu.memory_space<vmem>>, vector<16x128xbf16>
    tpu.vector_store %arg10[%c0_28, %c0_29], %53 {strides = array<i32>} : memref<16x128xbf16, #tpu.memory_space<vmem>>, vector<16x128xbf16>,
    return
  }
  func.func @transform_0(%arg0: i32) -> (i32, i32) {
    %c0_i32 = arith.constant 0 : i32
    %c0_i32_0 = arith.constant 0 : i32
    return %arg0, %c0_i32 : i32, i32
  }
  func.func @transform_1(%arg0: i32) -> (i32, i32) {
    %c0_i32 = arith.constant 0 : i32
    %c0_i32_0 = arith.constant 0 : i32
    %c0_i32_1 = arith.constant 0 : i32
    return %c0_i32, %c0_i32_0 : i32, i32
  }
  func.func @transform_2(%arg0: i32) -> (i32, i32) {
    %c0_i32 = arith.constant 0 : i32
    %c0_i32_0 = arith.constant 0 : i32
    %c0_i32_1 = arith.constant 0 : i32
    return %c0_i32, %c0_i32_0 : i32, i32
  }
  func.func @transform_3(%arg0: i32) -> (i32, i32) {
    %c0_i32 = arith.constant 0 : i32
    %c0_i32_0 = arith.constant 0 : i32
    %c0_i32_1 = arith.constant 0 : i32
    return %c0_i32, %c0_i32_0 : i32, i32
  }
  func.func @transform_4(%arg0: i32) -> (i32, i32) {
    %c0_i32 = arith.constant 0 : i32
    %c0_i32_0 = arith.constant 0 : i32
    %c0_i32_1 = arith.constant 0 : i32
    return %c0_i32, %c0_i32_0 : i32, i32
  }
  func.func @transform_5(%arg0: i32) -> (i32, i32) {
    %c0_i32 = arith.constant 0 : i32
    %c0_i32_0 = arith.constant 0 : i32
    %c0_i32_1 = arith.constant 0 : i32
    return %c0_i32, %c0_i32_0 : i32, i32
  }
  func.func @transform_6(%arg0: i32) -> (i32, i32) {
    %c0_i32 = arith.constant 0 : i32
    %c0_i32_0 = arith.constant 0 : i32
    %c0_i32_1 = arith.constant 0 : i32
    return %c0_i32, %c0_i32_0 : i32, i32
  }
  func.func @transform_7(%arg0: i32) -> (i32, i32) {
    %c0_i32 = arith.constant 0 : i32
    %c0_i32_0 = arith.constant 0 : i32
    %c0_i32_1 = arith.constant 0 : i32
    return %c0_i32, %c0_i32_0 : i32, i32
  }
  func.func @transform_8(%arg0: i32) -> (i32, i32) {
    %c0_i32 = arith.constant 0 : i32
    %c0_i32_0 = arith.constant 0 : i32
    %c0_i32_1 = arith.constant 0 : i32
    return %c0_i32, %c0_i32_0 : i32, i32
  }
  func.func @transform_9(%arg0: i32) -> (i32, i32) {
    %c0_i32 = arith.constant 0 : i32
    %c0_i32_0 = arith.constant 0 : i32
    return %arg0, %c0_i32 : i32, i32
  }
}

</mosaic_0001>

<bundles_post_ra>
// kernel: radio_encoder_forward.1
= control target key start
LH: loop header
LB: loop body
LE: loop exit
PB: predicated region body
PF: predicated region fallthrough
CT: control target
= control target key end

     0   :  { %v69_v50 = vlaneseq  ;;  %vm864_vm0 = vmmov 0   ;;  %s1107_s1 = inlined_call_operand.vmem [shape: bf16[256,256], index: 1, kind: input, shape index: {}]   ;;  %s1108_s0 = inlined_call_operand.vmem [shape: bf16[16,256], index: 0, kind: input, shape index: {}]   ;;  %s1109_s2 = inlined_call_operand.vmem [shape: bf16[256,128], index: 2, kind: input, shape index: {}]   ;;  %s1110_s4 = inlined_call_operand.vmem [shape: f32[1,256], index: 4, kind: input, shape index: {}]   ;;  %s1111_s3 = inlined_call_operand.vmem [shape: bf16[128,128], index: 3, kind: input, shape index: {}]   ;;  %s1112_s5 = inlined_call_operand.vmem [shape: f32[1,128], index: 5, kind: input, shape index: {}]   ;;  %s1113_s6 = inlined_call_operand.vmem [shape: f32[1,128], index: 6, kind: input, shape index: {}]   ;;  %s1114_s7 = inlined_call_operand.vmem [shape: f32[1,128], index: 7, kind: input, shape index: {}]   ;;  %s1115_s8 = inlined_call_operand.vmem [shape: f32[1,128], index: 8, kind: input, shape index: {}]   ;;  %s1116_s9 = inlined_call_operand.vmem [shape: bf16[16,128], index: 9, kind: output, shape index: {}]  }
   0x1   :  { %v780_v0 = vld [vmem:[%s1107_s1 + $0x74] ss:$8 sps:$4 sm:$0xff]   ;;  %v782_v1 = vld [vmem:[%s1107_s1 + $0x70] ss:$8 sps:$4 sm:$0xff]   ;;  %v783_v2 = vld [vmem:[%s1107_s1 + $0x64] ss:$8 sps:$4 sm:$0xff]  }
   0x2   :  { %249 = vmatprep.subr.bf16.mxu0 %v780_v0  ;;  %v785_v3 = vld [vmem:[%s1107_s1 + $0x60] ss:$8 sps:$4 sm:$0xff]   ;;  %v786_v4 = vld [vmem:[%s1107_s1 + $0x54] ss:$8 sps:$4 sm:$0xff]   ;;  %v788_v5 = vld [vmem:[%s1107_s1 + $0x50] ss:$8 sps:$4 sm:$0xff]  }
   0x3   :  { %250 = vmatpush1.bf16.msra.mxu0 %v782_v1  ;;  %v789_v6 = vld [vmem:[%s1107_s1 + $0x44] ss:$8 sps:$4 sm:$0xff]   ;;  %v791_v7 = vld [vmem:[%s1107_s1 + $0x40] ss:$8 sps:$4 sm:$0xff]   ;;  %v792_v8 = vld [vmem:[%s1107_s1 + $0x34] ss:$8 sps:$4 sm:$0xff]  }
   0x4   :  { %251 = vmatprep.subr.bf16.mxu0 %v783_v2  ;;  %v794_v9 = vld [vmem:[%s1107_s1 + $0x30] ss:$8 sps:$4 sm:$0xff]   ;;  %v795_v10 = vld [vmem:[%s1107_s1 + $0x24] ss:$8 sps:$4 sm:$0xff]   ;;  %v797_v11 = vld [vmem:[%s1107_s1 + $0x20] ss:$8 sps:$4 sm:$0xff]  }
   0x5   :  { %v798_v12 = vld [vmem:[%s1107_s1 + $0x14] ss:$8 sps:$4 sm:$0xff]   ;;  %v800_v13 = vld [vmem:[%s1107_s1 + $0x10] ss:$8 sps:$4 sm:$0xff]   ;;  %v801_v14 = vld [vmem:[%s1107_s1 + $0x4] ss:$8 sps:$4 sm:$0xff]  }
   0x6   :  { %v830_v15 = vld [vmem:[%s1108_s0 + $0x4] ss:$8 sps:$4 sm:$0xff]   ;;  %v831_v16 = vld [vmem:[%s1109_s2 + $0x78] sm:$0xff]   ;;  %v803_v18 = vld [vmem:[%s1107_s1] ss:$8 sps:$4 sm:$0xff]   ;;  %v70_v51 = vshrl.u32 %v69_v50, 7 }
   0x7   :  { %252 = vmatpush1.bf16.msra.mxu0 %v785_v3  ;;  %281 = vmatprep.mubr.bf16.mxu0 %v830_v15  ;;  %v832_v17 = vld [vmem:[%s1109_s2 + $0x38] sm:$0xff]   ;;  %v833_v19 = vld [vmem:[%s1109_s2 + $0x70] sm:$0xff]   ;;  %v835_v21 = vld [vmem:[%s1109_s2 + $0x68] sm:$0xff]  }
   0x8   :  { %253 = vmatprep.subr.bf16.mxu0 %v786_v4  ;;  %727 = vmatprep.subr.bf16.mxu1 %v831_v16  ;;  %v834_v20 = vld [vmem:[%s1109_s2 + $0x30] sm:$0xff]   ;;  %v836_v24 = vld [vmem:[%s1109_s2 + $0x28] sm:$0xff]   ;;  %v837_v25 = vld [vmem:[%s1109_s2 + $0x60] sm:$0xff]   ;;  %v75_v52 = vsub.s32 1, %v70_v51  ;;  %v71_v53 = vsub.s32 0, %v70_v51  ;;  %v863_v4 = vmov 0.0  }
   0x9   :  { %728 = vmatpush3.bf16.msra.mxu1 %v832_v17  ;;  %v804_v22 = vld [vmem:[%s1107_s1 + $0xf4] ss:$8 sps:$4 sm:$0xff]   ;;  %v806_v23 = vld [vmem:[%s1107_s1 + $0xf0] ss:$8 sps:$4 sm:$0xff]   ;;  %v807_v26 = vld [vmem:[%s1107_s1 + $0xe4] ss:$8 sps:$4 sm:$0xff]  }
   0xa   :  { %729 = vmatprep.subr.bf16.mxu1 %v833_v19  ;;  %v838_v27 = vld [vmem:[%s1109_s2 + $0x20] sm:$0xff]   ;;  %v839_v29 = vld [vmem:[%s1109_s2 + $0x58] sm:$0xff]   ;;  %v841_v44 = vld [vmem:[%s1109_s2 + $0x50] sm:$0xff]  }
   0xb   :  { %254 = vmatpush1.bf16.msra.mxu0 %v788_v5  ;;  %v809_v28 = vld [vmem:[%s1107_s1 + $0xe0] ss:$8 sps:$4 sm:$0xff]   ;;  %v810_v30 = vld [vmem:[%s1107_s1 + $0xd4] ss:$8 sps:$4 sm:$0xff]   ;;  %v812_v32 = vld [vmem:[%s1107_s1 + $0xd0] ss:$8 sps:$4 sm:$0xff]  }
   0xc   :  { %255 = vmatprep.subr.bf16.mxu0 %v789_v6  ;;  %v840_v31 = vld [vmem:[%s1109_s2 + $0x18] sm:$0xff]   ;;  %v813_v33 = vld [vmem:[%s1107_s1 + $0xc4] ss:$8 sps:$4 sm:$0xff]   ;;  %v815_v34 = vld [vmem:[%s1107_s1 + $0xc0] ss:$8 sps:$4 sm:$0xff]  }
   0xd   :  { %730 = vmatpush3.bf16.msra.mxu1 %v834_v20  ;;  %v816_v35 = vld [vmem:[%s1107_s1 + $0xb4] ss:$8 sps:$4 sm:$0xff]   ;;  %v818_v36 = vld [vmem:[%s1107_s1 + $0xb0] ss:$8 sps:$4 sm:$0xff]   ;;  %v819_v37 = vld [vmem:[%s1107_s1 + $0xa4] ss:$8 sps:$4 sm:$0xff]  }
   0xe   :  { %731 = vmatprep.subr.bf16.mxu1 %v835_v21  ;;  %v821_v38 = vld [vmem:[%s1107_s1 + $0xa0] ss:$8 sps:$4 sm:$0xff]   ;;  %v822_v39 = vld [vmem:[%s1107_s1 + $0x94] ss:$8 sps:$4 sm:$0xff]   ;;  %v824_v40 = vld [vmem:[%s1107_s1 + $0x90] ss:$8 sps:$4 sm:$0xff]  }
   0xf   :  { %256 = vmatpush1.bf16.msra.mxu0 %v791_v7  ;;  %v825_v41 = vld [vmem:[%s1107_s1 + $0x84] ss:$8 sps:$4 sm:$0xff]   ;;  %v827_v42 = vld [vmem:[%s1107_s1 + $0x80] ss:$8 sps:$4 sm:$0xff]   ;;  %v842_v45 = vld [vmem:[%s1109_s2 + $0x10] sm:$0xff]  }
  0x10   :  { %257 = vmatprep.subr.bf16.mxu0 %v792_v8  ;;  %v828_v43 = vld [vmem:[%s1108_s0] ss:$8 sps:$4 sm:$0xff]   ;;  %v847_v3 = vld [vmem:[%s1111_s3 + $0x38] sm:$0xff]   ;;  %v848_v5 = vld [vmem:[%s1111_s3 + $0x30] sm:$0xff]  }
  0x11   :  { %732 = vmatpush3.bf16.msra.mxu1 %v836_v24  ;;  %v843_v46 = vld [vmem:[%s1109_s2 + $0x48] sm:$0xff]   ;;  %v845_v48 = vld [vmem:[%s1109_s2 + $0x40] sm:$0xff]   ;;  %v851_v8 = vld [vmem:[%s1111_s3 + $0x18] sm:$0xff]  }
  0x12   :  { %733 = vmatprep.subr.bf16.mxu1 %v837_v25  ;;  %v844_v47 = vld [vmem:[%s1109_s2 + $0x8] sm:$0xff]   ;;  %v846_v49 = vld [vmem:[%s1109_s2] sm:$0xff]  }
  0x13   :  { %258 = vmatpush1.bf16.msra.mxu0 %v794_v9  ;;  %v67_v55 = vld [vmem:[%s1110_s4] sm:$0x3]  ;;  %v849_v6 = vld [vmem:[%s1111_s3 + $0x28] sm:$0xff]   ;;  %v852_v9 = vld [vmem:[%s1111_s3 + $0x10] sm:$0xff]  }
  0x14   :  { %259 = vmatprep.subr.bf16.mxu0 %v795_v10  ;;  %v76_v57 = vrot.slane %v67_v55, %v75_v52  ;;  %v72_v58 = vrot.slane %v67_v55, %v71_v53  ;;  %v850_v7 = vld [vmem:[%s1111_s3 + $0x20] sm:$0xff]   ;;  %v853_v10 = vld [vmem:[%s1111_s3 + $0x8] sm:$0xff]  }
  0x15   :  { %734 = vmatpush3.bf16.msra.mxu1 %v838_v27 }
  0x16   :  { %735 = vmatprep.subr.bf16.mxu1 %v839_v29 }
  0x17   :  { %260 = vmatpush1.bf16.msra.mxu0 %v797_v11  ;;  %v854_v11 = vld [vmem:[%s1111_s3] sm:$0xff]  }
  0x18   :  { %261 = vmatprep.subr.bf16.mxu0 %v798_v12 }
  0x19   :  { %736 = vmatpush3.bf16.msra.mxu1 %v840_v31 }
  0x1a   :  { %737 = vmatprep.subr.bf16.mxu1 %v841_v44 }
  0x1b   :  { %262 = vmatpush1.bf16.msra.mxu0 %v800_v13  ;;  %v690_v13 = vld [vmem:[%s1112_s5] ss:$0 sm:$0xff] }
  0x1c   :  { %263 = vmatprep.subr.bf16.mxu0 %v801_v14 }
  0x1d   :  { %738 = vmatpush3.bf16.msra.mxu1 %v842_v45 }
  0x1e   :  { %739 = vmatprep.subr.bf16.mxu1 %v843_v46 }
  0x1f   :  { %264 = vmatpush1.bf16.msra.mxu0 %v803_v18 }
  0x20   :  { %265 = vmatprep.subr.bf16.mxu0 %v804_v22 }
  0x21   :  { %740 = vmatpush3.bf16.msra.mxu1 %v844_v47 }
  0x22   :  { %741 = vmatprep.subr.bf16.mxu1 %v845_v48 }
  0x23   :  { %266 = vmatpush2.bf16.msra.mxu0 %v806_v23 }
  0x24   :  { %267 = vmatprep.subr.bf16.mxu0 %v807_v26 }
  0x25   :  { %742 = vmatpush3.bf16.msra.mxu1 %v846_v49 }
  0x26   :  { %758 = vmatprep.subr.bf16.mxu1 %v863_v4 }
  0x27   :  { %268 = vmatpush2.bf16.msra.mxu0 %v809_v28 }
  0x28   :  { %269 = vmatprep.subr.bf16.mxu0 %v810_v30 }
  0x2b   :  { %270 = vmatpush2.bf16.msra.mxu0 %v812_v32 }
  0x2c   :  { %271 = vmatprep.subr.bf16.mxu0 %v813_v33 }
  0x2f   :  { %272 = vmatpush2.bf16.msra.mxu0 %v815_v34 }
  0x30   :  { %273 = vmatprep.subr.bf16.mxu0 %v816_v35 }
  0x33   :  { %274 = vmatpush2.bf16.msra.mxu0 %v818_v36 }
  0x34   :  { %275 = vmatprep.subr.bf16.mxu0 %v819_v37 }
  0x37   :  { %276 = vmatpush2.bf16.msra.mxu0 %v821_v38 }
  0x38   :  { %277 = vmatprep.subr.bf16.mxu0 %v822_v39 }
  0x3b   :  { %278 = vmatpush2.bf16.msra.mxu0 %v824_v40  ;;  %v707_v40 = vld [vmem:[%s1113_s6] ss:$0 sm:$0xff] }
  0x3c   :  { %279 = vmatprep.subr.bf16.mxu0 %v825_v41 }
  0x3f   :  { %280 = vmatpush2.bf16.msra.mxu0 %v827_v42 }
  0x42   :  { %282 = vmatmul.mubr.bf16.vlgmr.msra.gmra.mxu0 %v828_v43 }
 0x102   :  { %v283_v54 = vpop.f32.mrf.mxu0 }
 0x103   :  { %v284_v0 = vadd.f32 %v283_v54, %v72_v58 }
 0x104   :  { %v285_v56 = vpop.f32.mrf.mxu0 }
 0x105   :  { %v286_v62 = vadd.f32 %v285_v56, %v76_v57 }
 0x106   :  { %v287_v59 = vpop.f32.mrf.mxu0 }
 0x107   :  { %v288_v60 = vadd.f32 %v287_v59, %v72_v58 }
 0x108   :  { %v289_v61 = vpop.f32.mrf.mxu0 }
 0x109   :  { %v290_v63 = vadd.f32 %v289_v61, %v76_v57  ;;  %v292_v2 = vpack.c.bf16 %v288_v60, %v284_v0 }
 0x10b   :  { %v293_v1 = vpack.c.bf16 %v290_v63, %v286_v62  ;;  %v716_v63 = vld [vmem:[%s1114_s7] ss:$0 sm:$0xff] }
 0x10d   :  { %461 = vmatprep.mubr.bf16.mxu1 %v293_v1 }
 0x10e   :  { %462 = vmatmul.mubr.bf16.vlgmr.msra.gmra.mxu1 %v292_v2 }
 0x10f   :  { %759 = vmatpush3.bf16.msra.mxu1 %v847_v3  ;;  %774 = vmatprep.mubr.msk.bf16.mxu1 %vm864_vm0, %v863_v4  ;;  %v717_v3 = vld [vmem:[%s1115_s8] ss:$0 sm:$0xff] }
 0x110   :  { %760 = vmatprep.subr.bf16.mxu1 %v863_v4 }
 0x113   :  { %761 = vmatpush3.bf16.msra.mxu1 %v848_v5 }
 0x114   :  { %762 = vmatprep.subr.bf16.mxu1 %v863_v4 }
 0x117   :  { %763 = vmatpush3.bf16.msra.mxu1 %v849_v6 }
 0x118   :  { %764 = vmatprep.subr.bf16.mxu1 %v863_v4 }
 0x11b   :  { %765 = vmatpush3.bf16.msra.mxu1 %v850_v7 }
 0x11c   :  { %766 = vmatprep.subr.bf16.mxu1 %v863_v4 }
 0x11f   :  { %767 = vmatpush3.bf16.msra.mxu1 %v851_v8 }
 0x120   :  { %768 = vmatprep.subr.bf16.mxu1 %v863_v4 }
 0x123   :  { %769 = vmatpush3.bf16.msra.mxu1 %v852_v9 }
 0x124   :  { %770 = vmatprep.subr.bf16.mxu1 %v863_v4 }
 0x127   :  { %771 = vmatpush3.bf16.msra.mxu1 %v853_v10 }
 0x128   :  { %772 = vmatprep.subr.bf16.mxu1 %v863_v4 }
 0x12b   :  { %773 = vmatpush3.bf16.msra.mxu1 %v854_v11 }
 0x1ce   :  { %v743_v12 = vpop.f32.mrf.mxu1 }
 0x1d0   :  { %v744_v14 = vpop.f32.mrf.mxu1 }
 0x1d1   :  { %v745_v15 = vadd.f32 %v744_v14, %v743_v12 }
 0x1d2   :  { %v746_v16 = vpop.f32.mrf.mxu1 }
 0x1d3   :  { %v464_v17 = vadd.f32 %v745_v15, %v690_v13 }
 0x1d4   :  { %v747_v18 = vpop.f32.mrf.mxu1 }
 0x1d5   :  { %v470_v19 = vmul.f32 %v464_v17, %v464_v17  ;;  %v748_v20 = vadd.f32 %v747_v18, %v746_v16 }
 0x1d7   :  { %v472_v21 = vmul.f32 %v470_v19, %v464_v17  ;;  %v467_v22 = vadd.f32 %v748_v20, %v690_v13 }
 0x1d9   :  { %v474_v23 = vmul.f32 0.044715, %v472_v21  ;;  %v471_v24 = vmul.f32 %v467_v22, %v467_v22 }
 0x1db   :  { %v476_v25 = vadd.f32 %v474_v23, %v464_v17  ;;  %v473_v26 = vmul.f32 %v471_v24, %v467_v22 }
 0x1dd   :  { %v478_v27 = vmul.f32 0.7978846, %v476_v25  ;;  %v475_v28 = vmul.f32 0.044715, %v473_v26 }
 0x1df   :  { %855 = vtanh.f32 %v478_v27  ;;  %v477_v29 = vadd.f32 %v475_v28, %v467_v22 }
 0x1e1   :  { %v479_v30 = vmul.f32 0.7978846, %v477_v29 }
 0x1e3   :  { %857 = vtanh.f32 %v479_v30 }
 0x1ec   :  { %v856_v31 = vpop.eup %855 }
 0x1ed   :  { %v482_v32 = vadd.f32 1.0, %v856_v31 }
 0x1ef   :  { %v484_v35 = vmul.f32 0.5, %v482_v32 }
 0x1f0   :  { %v858_v33 = vpop.eup %857 }
 0x1f1   :  { %v483_v34 = vadd.f32 1.0, %v858_v33  ;;  %v486_v37 = vmul.f32 %v484_v35, %v464_v17 }
 0x1f3   :  { %v485_v36 = vmul.f32 0.5, %v483_v34 }
 0x1f5   :  { %v487_v38 = vmul.f32 %v485_v36, %v467_v22 }
 0x1f7   :  { %v488_v39 = vpack.c.bf16 %v487_v38, %v486_v37 }
 0x1f9   :  { %775 = vmatmul.mubr.bf16.vlgmr.msra.gmra.mxu1 %v488_v39 }
 0x2b9   :  { %v594_v41 = vpop.f32.mrf.mxu1 }
 0x2ba   :  { %v595_v42 = vadd.f32 %v707_v40, %v594_v41 }
 0x2bb   :  { %v776_v43 = vpop.f32.mrf.mxu1 }
 0x2bc   :  { %601 = vadd.xlane.f32.xlu0 %v595_v42 }
 0x2bd   :  { %v597_v44 = vpop.f32.mrf.mxu1 }
 0x2be   :  { %v598_v45 = vadd.f32 %v707_v40, %v597_v44 }
 0x2bf   :  { %v777_v46 = vpop.f32.mrf.mxu1 }
 0x2c0   :  { %603 = vadd.xlane.f32.xlu0 %v598_v45 }
 0x345   :  { %v602_v47 = vpop.xlane.xlu0 %601 }
 0x346   :  { %v606_v48 = vmul.f32 0.0078125, %v602_v47 }
 0x348   :  { %v608_v49 = vsub.f32 %v595_v42, %v606_v48 }
 0x349   :  { %v604_v50 = vpop.xlane.xlu0 %603 }
 0x34a   :  { %v607_v51 = vmul.f32 0.0078125, %v604_v50  ;;  %v610_v52 = vmul.f32 %v608_v49, %v608_v49 }
 0x34c   :  { %v609_v53 = vsub.f32 %v598_v45, %v607_v51  ;;  %612 = vadd.xlane.f32.xlu1 %v610_v52 }
 0x34e   :  { %v611_v54 = vmul.f32 %v609_v53, %v609_v53 }
 0x350   :  { %614 = vadd.xlane.f32.xlu1 %v611_v54 }
 0x3d5   :  { %v613_v55 = vpop.xlane.xlu1 %612 }
 0x3d6   :  { %v616_v56 = vmul.f32 0.0078125, %v613_v55 }
 0x3d8   :  { %v618_v57 = vadd.f32 1e-05, %v616_v56 }
 0x3d9   :  { %v615_v58 = vpop.xlane.xlu1 %614 }
 0x3da   :  { %859 = vrsqrt.f32 %v618_v57  ;;  %v617_v59 = vmul.f32 0.0078125, %v615_v58 }
 0x3dc   :  { %v619_v60 = vadd.f32 1e-05, %v617_v59 }
 0x3de   :  { %861 = vrsqrt.f32 %v619_v60 }
 0x3e7   :  { %v860_v61 = vpop.eup %859 }
 0x3e8   :  { %v622_v62 = vmul.f32 %v860_v61, %v608_v49 }
 0x3ea   :  { %v631_v1 = vmul.f32 %v716_v63, %v622_v62 }
 0x3eb   :  { %v862_v0 = vpop.eup %861 }
 0x3ec   :  { %v623_v2 = vmul.f32 %v862_v0, %v609_v53  ;;  %v640_v5 = vadd.f32 %v717_v3, %v631_v1 }
 0x3ee   :  { %v632_v4 = vmul.f32 %v716_v63, %v623_v2 }
 0x3f0   :  { %v641_v6 = vadd.f32 %v717_v3, %v632_v4 }
 0x3f2   :  { %v725_v7 = vpack.c.bf16 %v641_v6, %v640_v5 }
 0x3f4   :  { %726 = vst [vmem:[%s1116_s9] sm:$0xff] %v725_v7  }

</bundles_post_ra>
